<compile_context>
chip_gen: v6e
topology: v6e:2x2x1
jax: 0.10.0
libtpu: 0.0.40
codegen_flags: <defaults>
</compile_context>

<pallas_src>
import jax
import jax.numpy as jnp
from jax.experimental import pallas as pl
from jax.experimental.pallas import tpu as pltpu

K = 3                                   # kernel_size = stride = 3, no padding, floor mode
_LANE = 128                             # TPU lane width
_TARGET_TILE_BYTES = 2 * 1024 * 1024    # ~2 MiB input tile per grid step


def _maxpool_kernel(x_ref, o_ref):
    # x_ref: (K*R, W, NCpad)  -- the K*R input rows feeding this block of output rows
    # o_ref: (R, Wo, NCpad)   -- R pooled output rows
    r_blk, wo, _ = o_ref.shape
    acc = x_ref[pl.ds(0, r_blk, stride=K), pl.ds(0, wo, stride=K), :]
    for dr in range(K):                 # row phase of the 3x3 window
        for dc in range(K):             # column phase of the 3x3 window
            if dr == 0 and dc == 0:
                continue
            win = x_ref[pl.ds(dr, r_blk, stride=K), pl.ds(dc, wo, stride=K), :]
            acc = jnp.maximum(acc, win)
    o_ref[...] = acc                    # dense, lane-aligned store (NCpad % 128 == 0)


def maxpool2d_k3(x_nchw):
    """Equivalent of torch.nn.MaxPool2d(kernel_size=3, ceil_mode=False) on NCHW input."""
    n, c, h, w = x_nchw.shape
    ho = (h - K) // K + 1               # floor mode
    wo = (w - K) // K + 1
    if ho <= 0 or wo <= 0:              # degenerate spatial dims
        return jnp.zeros((n, c, max(ho, 0), max(wo, 0)), x_nchw.dtype)

    nc = n * c
    ncp = ((nc + _LANE - 1) // _LANE) * _LANE   # lane-dense last dim

    # Glue: NCHW -> (H, W, NCpad); pooling windows live on major/sublane axes,
    # batch*channels ride the 128-wide lane axis.
    x_hwc = jnp.transpose(x_nchw, (2, 3, 0, 1)).reshape(h, w, nc)
    if ncp != nc:
        x_hwc = jnp.pad(x_hwc, ((0, 0), (0, 0), (0, ncp - nc)))

    # Pick R output rows per grid step so the input tile is ~2 MiB (keeps the
    # kernel off per-step-overhead territory while double-buffered tiles stay
    # well under the 16/32 MiB default scoped-VMEM limits of v5e/v6e/v7x).
    itemsize = jnp.dtype(x_nchw.dtype).itemsize
    bytes_per_out_row = K * w * ncp * itemsize
    r = int(max(1, min(ho, _TARGET_TILE_BYTES // max(1, bytes_per_out_row))))
    grid = (pl.cdiv(ho, r),)

    out_hwc = pl.pallas_call(
        _maxpool_kernel,
        out_shape=jax.ShapeDtypeStruct((ho, wo, ncp), x_nchw.dtype),
        grid=grid,
        in_specs=[pl.BlockSpec((K * r, w, ncp), lambda i: (i, 0, 0))],
        out_specs=pl.BlockSpec((r, wo, ncp), lambda i: (i, 0, 0)),
        compiler_params=pltpu.CompilerParams(
            dimension_semantics=("parallel",)),
    )(x_hwc)

    # Glue: (Ho, Wo, NCpad) -> NCHW, dropping the lane padding.
    out = out_hwc[:, :, :nc].reshape(ho, wo, n, c)
    return jnp.transpose(out, (2, 3, 0, 1))


if __name__ == "__main__":
    key = jax.random.PRNGKey(0)
    x = jax.random.normal(key, (2, 4, 16, 16), dtype=jnp.float32)

    out = jax.block_until_ready(maxpool2d_k3(x))

    # Reference: floor-mode max pool, kernel=3, stride=3, no padding.
    ref = jax.lax.reduce_window(
        x, -jnp.inf, jax.lax.max, (1, 1, K, K), (1, 1, K, K), "VALID")
    assert out.shape == (2, 4, 5, 5), out.shape
    assert out.dtype == x.dtype
    assert jnp.allclose(out, ref)
    print("KERNEL_OK")
</pallas_src>

<mosaic_0001>
module attributes {stable_mosaic.version = 11 : i64} {
  func.func @_maxpool_kernel(%arg0: i32, %arg1: memref<15x16x128xf32, #tpu.memory_space<vmem>>, %arg2: memref<5x5x128xf32, #tpu.memory_space<vmem>>) attributes {dimension_semantics = [#tpu.dimension_semantics<parallel>], iteration_bounds = array<i64: 1>, scalar_prefetch = 0 : i64, scratch_operands = 0 : i64, tpu.core_type = #tpu.core_type<tc>, window_params = [{transform_indices = @transform_0, window_bounds = array<i64: 15, 16, 128>}, {transform_indices = @transform_1, window_bounds = array<i64: 5, 5, 128>}]} {
    %c0 = arith.constant 0 : index
    %c0_0 = arith.constant 0 : index
    %c0_1 = arith.constant 0 : index
    %0 = tpu.strided_load %arg1[%c0, %c0_0, %c0_1] {strides = array<i32: 3, 3, 1>} : memref<15x16x128xf32, #tpu.memory_space<vmem>>, vector<5x5x128xf32>
    %c0_2 = arith.constant 0 : index
    %c1 = arith.constant 1 : index
    %c0_3 = arith.constant 0 : index
    %1 = tpu.strided_load %arg1[%c0_2, %c1, %c0_3] {strides = array<i32: 3, 3, 1>} : memref<15x16x128xf32, #tpu.memory_space<vmem>>, vector<5x5x128xf32>
    %2 = arith.maximumf %0, %1 : vector<5x5x128xf32>
    %c0_4 = arith.constant 0 : index
    %c2 = arith.constant 2 : index
    %c0_5 = arith.constant 0 : index
    %3 = tpu.strided_load %arg1[%c0_4, %c2, %c0_5] {strides = array<i32: 3, 3, 1>} : memref<15x16x128xf32, #tpu.memory_space<vmem>>, vector<5x5x128xf32>
    %4 = arith.maximumf %2, %3 : vector<5x5x128xf32>
    %c1_6 = arith.constant 1 : index
    %c0_7 = arith.constant 0 : index
    %c0_8 = arith.constant 0 : index
    %5 = tpu.strided_load %arg1[%c1_6, %c0_7, %c0_8] {strides = array<i32: 3, 3, 1>} : memref<15x16x128xf32, #tpu.memory_space<vmem>>, vector<5x5x128xf32>
    %6 = arith.maximumf %4, %5 : vector<5x5x128xf32>
    %c1_9 = arith.constant 1 : index
    %c1_10 = arith.constant 1 : index
    %c0_11 = arith.constant 0 : index
    %7 = tpu.strided_load %arg1[%c1_9, %c1_10, %c0_11] {strides = array<i32: 3, 3, 1>} : memref<15x16x128xf32, #tpu.memory_space<vmem>>, vector<5x5x128xf32>
    %8 = arith.maximumf %6, %7 : vector<5x5x128xf32>
    %c1_12 = arith.constant 1 : index
    %c2_13 = arith.constant 2 : index
    %c0_14 = arith.constant 0 : index
    %9 = tpu.strided_load %arg1[%c1_12, %c2_13, %c0_14] {strides = array<i32: 3, 3, 1>} : memref<15x16x128xf32, #tpu.memory_space<vmem>>, vector<5x5x128xf32>
    %10 = arith.maximumf %8, %9 : vector<5x5x128xf32>
    %c2_15 = arith.constant 2 : index
    %c0_16 = arith.constant 0 : index
    %c0_17 = arith.constant 0 : index
    %11 = tpu.strided_load %arg1[%c2_15, %c0_16, %c0_17] {strides = array<i32: 3, 3, 1>} : memref<15x16x128xf32, #tpu.memory_space<vmem>>, vector<5x5x128xf32>
    %12 = arith.maximumf %10, %11 : vector<5x5x128xf32>
    %c2_18 = arith.constant 2 : index
    %c1_19 = arith.constant 1 : index
    %c0_20 = arith.constant 0 : index
    %13 = tpu.strided_load %arg1[%c2_18, %c1_19, %c0_20] {strides = array<i32: 3, 3, 1>} : memref<15x16x128xf32, #tpu.memory_space<vmem>>, vector<5x5x128xf32>
    %14 = arith.maximumf %12, %13 : vector<5x5x128xf32>
    %c2_21 = arith.constant 2 : index
    %c2_22 = arith.constant 2 : index
    %c0_23 = arith.constant 0 : index
    %15 = tpu.strided_load %arg1[%c2_21, %c2_22, %c0_23] {strides = array<i32: 3, 3, 1>} : memref<15x16x128xf32, #tpu.memory_space<vmem>>, vector<5x5x128xf32>
    %16 = arith.maximumf %14, %15 : vector<5x5x128xf32>
    %c0_24 = arith.constant 0 : index
    %c0_25 = arith.constant 0 : index
    %c0_26 = arith.constant 0 : index
    %17 = vector.load %arg2[%c0_24, %c0_25, %c0_26] : memref<5x5x128xf32, #tpu.memory_space<vmem>>, vector<5x5x128xf32>
    tpu.vector_store %arg2[%c0_24, %c0_25, %c0_26], %16 {strides = array<i32>} : memref<5x5x128xf32, #tpu.memory_space<vmem>>, vector<5x5x128xf32>,
    return
  }
  func.func @transform_0(%arg0: i32) -> (i32, i32, i32) {
    %c0_i32 = arith.constant 0 : i32
    %c0_i32_0 = arith.constant 0 : i32
    %c0_i32_1 = arith.constant 0 : i32
    return %arg0, %c0_i32, %c0_i32_0 : i32, i32, i32
  }
  func.func @transform_1(%arg0: i32) -> (i32, i32, i32) {
    %c0_i32 = arith.constant 0 : i32
    %c0_i32_0 = arith.constant 0 : i32
    %c0_i32_1 = arith.constant 0 : i32
    return %arg0, %c0_i32, %c0_i32_0 : i32, i32, i32
  }
}

</mosaic_0001>

<bundles_post_ra>
// kernel: tpu_custom_call.1
= control target key start
LH: loop header
LB: loop body
LE: loop exit
PB: predicated region body
PF: predicated region fallthrough
CT: control target
= control target key end

     0   :  { %6 = vsyncpa [#allocation3], 0  ;;  %s276_s0 = inlined_call_operand.hbm [shape: f32[16,16,128], index: 0, kind: input, shape index: {}]   ;;  %s277_s1 = inlined_call_operand.hbm [shape: f32[5,5,128], index: 1, kind: output, shape index: {}]  }
   0x1   :  { %7 = vsyncpa [#allocation4], 0  ;;  %s250_s6 = smov [#allocation2]  }
   0x2   :  { %s13_s7 = sshll.u32 %s250_s6, 4  ;;  %s14_s7 = int_to_ptr.vmem [resolvable:$true] %s13_s7 }
   0x3   :  { %s214_s8 = scalar_lea.vmem %s14_s7, 3840  ;;  %p219_p1 = scmp.lt.s32.totalorder %s14_s7, %s14_s7 }
   0x4   :  { %p215_p0 = scmp.ne.s32.totalorder %s14_s7, %s214_s8  ;;  %p220_p2 = scmp.lt.s32.totalorder %s214_s8, %s214_s8 }
   0x6   :  { %p221_p3 = por %p220_p2, %p219_p1 }
   0x8   :  { %p222_p4 = pnand %p221_p3, %p215_p0 }
   0xa   :  { %225 = shalt.err (!%p222_p4)
}
   0xb   :  { %s251_s9 = smov 128   ;;  %s252_s10 = smov 8  }
   0xc   :  { %19 = dma.hbm_to_vmem [thread:$0]  %s276_s0, 3840, %s14_s7, [#allocation3], %s251_s9, %s251_s9, %s252_s10  }
   0xd   :  { %246 = dma.done.wait [#allocation3], 3840  }
   0xe   :  { %247 = vsyncadd [#allocation3], 4294963456  ;;  %v23_v0 = vld [vmem:[#allocation2] ss:$3 sm:$0x1f]  ;;  %s253_s0 = smov [#allocation5]  }
   0xf   :  { %v33_v1 = vld [vmem:[#allocation2 + $0x1] ss:$3 sm:$0x1f]  ;;  %v48_v3 = vld [vmem:[#allocation2 + $0x2] ss:$3 sm:$0x1f] }
  0x10   :  { %v42_v2 = vmax.f32 %v23_v0, %v33_v1  ;;  %v63_v4 = vld [vmem:[#allocation2 + $0x10] ss:$3 sm:$0x1f]  ;;  %v78_v6 = vld [vmem:[#allocation2 + $0x11] ss:$3 sm:$0x1f] }
  0x11   :  { %v25_v7 = vld [vmem:[#allocation2 + $0x30] ss:$3 sm:$0x1f]  ;;  %v35_v9 = vld [vmem:[#allocation2 + $0x31] ss:$3 sm:$0x1f] }
  0x12   :  { %v57_v5 = vmax.f32 %v42_v2, %v48_v3  ;;  %v50_v10 = vld [vmem:[#allocation2 + $0x32] ss:$3 sm:$0x1f]  ;;  %v43_v12 = vmax.f32 %v25_v7, %v35_v9  ;;  %v65_v14 = vld [vmem:[#allocation2 + $0x40] ss:$3 sm:$0x1f] }
  0x13   :  { %v93_v11 = vld [vmem:[#allocation2 + $0x12] ss:$3 sm:$0x1f]  ;;  %v108_v15 = vld [vmem:[#allocation2 + $0x20] ss:$3 sm:$0x1f] }
  0x14   :  { %v72_v8 = vmax.f32 %v57_v5, %v63_v4  ;;  %v58_v16 = vmax.f32 %v43_v12, %v50_v10  ;;  %v80_v17 = vld [vmem:[#allocation2 + $0x41] ss:$3 sm:$0x1f]  ;;  %v27_v19 = vld [vmem:[#allocation2 + $0x60] ss:$3 sm:$0x1f] }
  0x15   :  { %v37_v20 = vld [vmem:[#allocation2 + $0x61] ss:$3 sm:$0x1f]  ;;  %v52_v24 = vld [vmem:[#allocation2 + $0x62] ss:$3 sm:$0x1f] }
  0x16   :  { %v87_v13 = vmax.f32 %v72_v8, %v78_v6  ;;  %v123_v21 = vld [vmem:[#allocation2 + $0x21] ss:$3 sm:$0x1f]  ;;  %v73_v22 = vmax.f32 %v58_v16, %v65_v14  ;;  %v44_v23 = vmax.f32 %v27_v19, %v37_v20  ;;  %v95_v26 = vld [vmem:[#allocation2 + $0x42] ss:$3 sm:$0x1f] }
  0x17   :  { %v67_v27 = vld [vmem:[#allocation2 + $0x70] ss:$3 sm:$0x1f]  ;;  %v138_v28 = vld [vmem:[#allocation2 + $0x22] ss:$3 sm:$0x1f] }
  0x18   :  { %v102_v18 = vmax.f32 %v87_v13, %v93_v11  ;;  %v88_v29 = vmax.f32 %v73_v22, %v80_v17  ;;  %v110_v30 = vld [vmem:[#allocation2 + $0x50] ss:$3 sm:$0x1f]  ;;  %v59_v31 = vmax.f32 %v44_v23, %v52_v24  ;;  %v82_v33 = vld [vmem:[#allocation2 + $0x71] ss:$3 sm:$0x1f] }
  0x19   :  { %v29_v34 = vld [vmem:[#allocation2 + $0x90] ss:$3 sm:$0x1f]  ;;  %v39_v37 = vld [vmem:[#allocation2 + $0x91] ss:$3 sm:$0x1f] }
  0x1a   :  { %v117_v25 = vmax.f32 %v102_v18, %v108_v15  ;;  %v103_v35 = vmax.f32 %v88_v29, %v95_v26  ;;  %v74_v36 = vmax.f32 %v59_v31, %v67_v27  ;;  %v54_v38 = vld [vmem:[#allocation2 + $0x92] ss:$3 sm:$0x1f]  ;;  %v125_v40 = vld [vmem:[#allocation2 + $0x51] ss:$3 sm:$0x1f]  ;;  %v45_v42 = vmax.f32 %v29_v34, %v39_v37 }
  0x1b   :  { %v97_v41 = vld [vmem:[#allocation2 + $0x72] ss:$3 sm:$0x1f]  ;;  %v69_v46 = vld [vmem:[#allocation2 + $0xa0] ss:$3 sm:$0x1f] }
  0x1c   :  { %v132_v32 = vmax.f32 %v117_v25, %v123_v21  ;;  %v118_v43 = vmax.f32 %v103_v35, %v110_v30  ;;  %v140_v44 = vld [vmem:[#allocation2 + $0x52] ss:$3 sm:$0x1f]  ;;  %v89_v45 = vmax.f32 %v74_v36, %v82_v33  ;;  %v112_v47 = vld [vmem:[#allocation2 + $0x80] ss:$3 sm:$0x1f]  ;;  %v60_v48 = vmax.f32 %v45_v42, %v54_v38 }
  0x1d   :  { %v84_v49 = vld [vmem:[#allocation2 + $0xa1] ss:$3 sm:$0x1f]  ;;  %v31_v52 = vld [vmem:[#allocation2 + $0xc0] ss:$3 sm:$0x1f] }
  0x1e   :  { %v147_v39 = vmax.f32 %v132_v32, %v138_v28  ;;  %v133_v50 = vmax.f32 %v118_v43, %v125_v40  ;;  %v104_v51 = vmax.f32 %v89_v45, %v97_v41  ;;  %v41_v53 = vld [vmem:[#allocation2 + $0xc1] ss:$3 sm:$0x1f]  ;;  %v75_v55 = vmax.f32 %v60_v48, %v69_v46  ;;  %v56_v57 = vld [vmem:[#allocation2 + $0xc2] ss:$3 sm:$0x1f] }
  0x1f   :  { %v127_v54 = vld [vmem:[#allocation2 + $0x81] ss:$3 sm:$0x1f]  ;;  %v46_v56 = vmax.f32 %v31_v52, %v41_v53  ;;  %v99_v60 = vld [vmem:[#allocation2 + $0xa2] ss:$3 sm:$0x1f] }
  0x20   :  { %152 = vst [vmem:[#allocation5] sm:$0x1f] %v147_v39  ;;  %v148_v58 = vmax.f32 %v133_v50, %v140_v44  ;;  %v119_v59 = vmax.f32 %v104_v51, %v112_v47  ;;  %v71_v61 = vld [vmem:[#allocation2 + $0xd0] ss:$3 sm:$0x1f]  ;;  %v90_v63 = vmax.f32 %v75_v55, %v84_v49  ;;  %s162_s13 = sshll.u32 %s253_s0, 4  ;;  %s163_s13 = int_to_ptr.vmem [resolvable:$true] %s162_s13 }
  0x21   :  { %v142_v62 = vld [vmem:[#allocation2 + $0x82] ss:$3 sm:$0x1f]  ;;  %v61_v0 = vmax.f32 %v46_v56, %v56_v57  ;;  %v114_v2 = vld [vmem:[#allocation2 + $0xb0] ss:$3 sm:$0x1f]  ;;  %p231_p6 = scmp.lt.s32.totalorder %s163_s13, %s163_s13 }
  0x22   :  { %153 = vst [vmem:[#allocation5 + $0x8] sm:$0x1f] %v148_v58  ;;  %v134_v1 = vmax.f32 %v119_v59, %v127_v54  ;;  %v86_v3 = vld [vmem:[#allocation2 + $0xd1] ss:$3 sm:$0x1f]  ;;  %v105_v4 = vmax.f32 %v90_v63, %v99_v60  ;;  %s226_s14 = scalar_lea.vmem %s163_s13, 640 }
  0x23   :  { %v76_v5 = vmax.f32 %v61_v0, %v71_v61  ;;  %v129_v7 = vld [vmem:[#allocation2 + $0xb1] ss:$3 sm:$0x1f]  ;;  %v101_v8 = vld [vmem:[#allocation2 + $0xd2] ss:$3 sm:$0x1f]  ;;  %p227_p5 = scmp.ne.s32.totalorder %s163_s13, %s226_s14  ;;  %p232_p7 = scmp.lt.s32.totalorder %s226_s14, %s226_s14 }
  0x24   :  { %v149_v6 = vmax.f32 %v134_v1, %v142_v62  ;;  %v120_v9 = vmax.f32 %v105_v4, %v114_v2  ;;  %v144_v11 = vld [vmem:[#allocation2 + $0xb2] ss:$3 sm:$0x1f]  ;;  %v116_v12 = vld [vmem:[#allocation2 + $0xe0] ss:$3 sm:$0x1f] }
  0x25   :  { %v91_v10 = vmax.f32 %v76_v5, %v86_v3  ;;  %v131_v15 = vld [vmem:[#allocation2 + $0xe1] ss:$3 sm:$0x1f]  ;;  %v146_v18 = vld [vmem:[#allocation2 + $0xe2] ss:$3 sm:$0x1f]  ;;  %p233_p8 = por %p232_p7, %p231_p6 }
  0x26   :  { %154 = vst [vmem:[#allocation5 + $0x10] sm:$0x1f] %v149_v6  ;;  %v135_v13 = vmax.f32 %v120_v9, %v129_v7 }
  0x27   :  { %v106_v14 = vmax.f32 %v91_v10, %v101_v8  ;;  %p234_p9 = pnand %p233_p8, %p227_p5 }
  0x28   :  { %v150_v16 = vmax.f32 %v135_v13, %v144_v11 }
  0x29   :  { %v121_v17 = vmax.f32 %v106_v14, %v116_v12 }
  0x2a   :  { %155 = vst [vmem:[#allocation5 + $0x18] sm:$0x1f] %v150_v16 }
  0x2b   :  { %v136_v19 = vmax.f32 %v121_v17, %v131_v15 }
  0x2d   :  { %v151_v20 = vmax.f32 %v136_v19, %v146_v18 }
  0x2f   :  { %156 = vst [vmem:[#allocation5 + $0x20] sm:$0x1f] %v151_v20 }
  0x30   :  { %237 = shalt.err (!%p234_p9)
}
  0x31   :  { %168 = dma.vmem_to_hbm [thread:$0]  %s163_s13, 640, %s277_s1, [#allocation4], %s251_s9, %s251_s9, %s252_s10  }
  0x32   :  { %248 = dma.done.wait [#allocation4], 640  }
  0x33   :  { %249 = vsyncadd [#allocation4], 4294966656 }
  0x34   :  { %172 = vsyncpa [#allocation3], 1 }
  0x35   :  { %173 = vsyncpa [#allocation4], 1 }

</bundles_post_ra>
